<compile_context>
chip_gen: v7x
topology: tpu7x:2x2x1
jax: 0.10.0
libtpu: 0.0.40
codegen_flags: <defaults>
</compile_context>

<pallas_src>
from collections import OrderedDict

import jax
import jax.numpy as jnp
from jax import lax
from jax.experimental import pallas as pl
from jax.experimental.pallas import tpu as pltpu


def _round_up(a: int, b: int) -> int:
    return (a + b - 1) // b * b


def _cdiv(a: int, b: int) -> int:
    return (a + b - 1) // b


def _pick_chunk_rows(block_rows: int) -> int:
    # Largest power-of-two chunk (<= 64 rows, i.e. 8 f32 vregs / tensor) that divides
    # the tile -> bounded live ranges, no VMEM temps, no vreg spills.
    for c in (64, 32, 16, 8):
        if block_rows % c == 0:
            return c
    return 8


def _make_bce_sum_kernel(block_rows: int, chunk_rows: int, steps_per_slice: int,
                         valid_rows: int, needs_mask: bool, binary_labels: bool):
    n_chunks = block_rows // chunk_rows
    sub = chunk_rows // 8

    def kernel(d1_ref, d2_ref, d3_ref, d4_ref, y_ref, o_ref):
        s_idx = pl.program_id(0)   # parallel (megacore) axis
        i_idx = pl.program_id(1)   # arbitrary (accumulation) axis

        @pl.when(i_idx == 0)
        def _init():
            o_ref[...] = jnp.zeros_like(o_ref)

        # Logical (unclamped) row offset of this tile; used only for tail masking.
        base_row = (s_idx * steps_per_slice + i_idx) * block_rows

        def chunk_body(c, acc):
            a1, a2, a3, a4 = acc
            r0 = pl.multiple_of(c * chunk_rows, chunk_rows)
            # Label chunk loaded once, reused by all four heads.
            y = y_ref[pl.ds(r0, chunk_rows), :].astype(jnp.float32)
            if needs_mask:
                rid = lax.broadcasted_iota(jnp.int32, (chunk_rows, 128), 0)
                valid = rid < (valid_rows - (base_row + r0))

            def head(x_ref, acc_h):
                x = x_ref[pl.ds(r0, chunk_rows), :].astype(jnp.float32)
                if binary_labels:
                    # 1 log/elem (exact for hard {0,1} labels only).
                    t = jnp.maximum(jnp.log(jnp.where(y > 0.5, x, 1.0 - x)), -100.0)
                else:
                    # Clamp before the blend so 0 * (-inf) never appears
                    # (matches nn.BCELoss, valid for soft targets too).
                    log_x = jnp.maximum(jnp.log(x), -100.0)
                    log_1mx = jnp.maximum(jnp.log(1.0 - x), -100.0)
                    t = log_1mx + y * (log_x - log_1mx)
                if needs_mask:
                    t = jnp.where(valid, t, 0.0)
                # (chunk_rows,128) -> (sub,8,128); axis-0 sum is a pure-VPU vreg
                # accumulation (no cross-lane XLU traffic in the hot loop).
                return acc_h + t.reshape(sub, 8, 128).sum(axis=0)

            return (head(d1_ref, a1), head(d2_ref, a2),
                    head(d3_ref, a3), head(d4_ref, a4))

        zero = jnp.zeros((8, 128), jnp.float32)
        a1, a2, a3, a4 = lax.fori_loop(0, n_chunks, chunk_body,
                                       (zero, zero, zero, zero),
                                       unroll=(n_chunks <= 8))

        # Accumulate into the per-slice output block (resident across the
        # arbitrary axis; written back to HBM once per slice).
        o_ref[0, 0] += a1
        o_ref[0, 1] += a2
        o_ref[0, 2] += a3
        o_ref[0, 3] += a4

    return kernel


def _prep_lane_dense(x, rows8: int):
    """Flatten to 1-D and reshape to a lane-dense (rows8, 128) slab.

    Pads with 1.0 (exactly zero BCE contribution) only when needed, i.e. only
    when the element count is not already a multiple of 8*128 — the common
    U2Net NCHW sizes hit the zero-copy path.
    """
    flat = x.reshape(-1)
    padded = rows8 * 128
    if flat.shape[0] != padded:
        flat = jnp.pad(flat, (0, padded - flat.shape[0]), constant_values=1.0)
    return flat.reshape(rows8, 128)


def u2net_loss_v6(pred, batch, *, max_block_rows: int = 2048,
                  binary_labels: bool = False):
    """JAX/Pallas equivalent of U2NetLossV6.forward.

    pred:  dict with 'd1'..'d4', each (B, C, H, W), values in (0, 1)
    batch: dict with 'label', same shape, values in [0, 1]
    binary_labels: enable the single-log fast path (exact only for {0,1} labels)
    returns (total_loss, OrderedDict of metrics)
    """
    d1, d2, d3, d4 = pred["d1"], pred["d2"], pred["d3"], pred["d4"]
    label = batch["label"]
    assert d1.shape == d2.shape == d3.shape == d4.shape == label.shape

    n = int(label.size)

    # Lane-dense layout: rows of 128 lanes, padded only to 8-sublane granularity.
    rows = _cdiv(n, 128)
    rows8 = _round_up(rows, 8)

    cap = max(8, _round_up(int(max_block_rows), 8))
    block_rows = min(cap, rows8)
    blocks_total = _cdiv(rows8, block_rows)

    # Leading "parallel" axis: 2 slices so v7x's two TensorCores each take one;
    # no-op on single-TC v5e/v6e.
    num_slices = 2 if blocks_total >= 2 else 1
    steps_per_slice = _cdiv(blocks_total, num_slices)
    covered_rows = num_slices * steps_per_slice * block_rows
    needs_mask = covered_rows != rows8               # partial / phantom tail blocks
    needs_clamp = num_slices * steps_per_slice != blocks_total   # phantom block exists

    d1f = _prep_lane_dense(d1, rows8)
    d2f = _prep_lane_dense(d2, rows8)
    d3f = _prep_lane_dense(d3, rows8)
    d4f = _prep_lane_dense(d4, rows8)
    yf = _prep_lane_dense(label, rows8)

    if needs_clamp:
        # Clamp the phantom block to the last valid block (its contribution is
        # masked to zero in-kernel) so no DMA ever reads outside the arrays.
        def in_idx(s, i):
            return (jnp.minimum(s * steps_per_slice + i, blocks_total - 1), 0)
    else:
        def in_idx(s, i):
            return (s * steps_per_slice + i, 0)

    in_spec = pl.BlockSpec((block_rows, 128), in_idx)
    out_spec = pl.BlockSpec((1, 4, 8, 128), lambda s, i: (s, 0, 0, 0))

    in_itemsize = sum(jnp.dtype(t.dtype).itemsize for t in (d1, d2, d3, d4, label))
    cost = pl.CostEstimate(
        flops=28 * n,                                     # ~7 VPU ops / elem / head
        transcendentals=(4 if binary_labels else 8) * n,  # logs / elem (4 heads)
        bytes_accessed=covered_rows * 128 * in_itemsize
        + num_slices * 4 * 8 * 128 * 4,
    )

    chunk_rows = _pick_chunk_rows(block_rows)
    kernel = _make_bce_sum_kernel(block_rows, chunk_rows, steps_per_slice,
                                  rows8, needs_mask, binary_labels)

    parts = pl.pallas_call(
        kernel,
        out_shape=jax.ShapeDtypeStruct((num_slices, 4, 8, 128), jnp.float32),
        grid=(num_slices, steps_per_slice),
        in_specs=[in_spec] * 5,
        out_specs=out_spec,
        compiler_params=pltpu.CompilerParams(
            dimension_semantics=("parallel", "arbitrary"),
            vmem_limit_bytes=32 * 1024 * 1024,
        ),
        cost_estimate=cost,
    )(d1f, d2f, d3f, d4f, yf)

    # Tiny wrapper-side reduction of the per-slice partial-sum tiles; the
    # mean's 1/n and the BCE negation are folded into a single scale.
    head_sums = parts.sum(axis=(0, 2, 3))          # (4,)
    means = head_sums * (-1.0 / float(n))

    d1_bce, d2_bce, d3_bce, d4_bce = means[0], means[1], means[2], means[3]
    bce_loss = d1_bce + d2_bce + d3_bce + d4_bce
    total_loss = bce_loss

    metrics = OrderedDict(
        d1_bce=d1_bce,
        d2_bce=d2_bce,
        d3_bce=d3_bce,
        d4_bce=d4_bce,
        bce_loss=bce_loss,
        total_loss=total_loss,
    )
    return total_loss, metrics


def _reference(pred, batch):
    """Pure-JAX reference (matches nn.BCELoss semantics)."""
    y = batch["label"].astype(jnp.float32)

    def bce_mean(x):
        x = x.astype(jnp.float32)
        log_x = jnp.maximum(jnp.log(x), -100.0)
        log_1mx = jnp.maximum(jnp.log(1.0 - x), -100.0)
        return jnp.mean(-(y * log_x + (1.0 - y) * log_1mx))

    terms = [bce_mean(pred[k]) for k in ("d1", "d2", "d3", "d4")]
    return terms[0] + terms[1] + terms[2] + terms[3]


def _make_inputs(key, shape, soft_labels=False):
    k1, k2, k3, k4, k5 = jax.random.split(key, 5)
    pred = {
        "d1": jax.nn.sigmoid(jax.random.normal(k1, shape, jnp.float32)),
        "d2": jax.nn.sigmoid(jax.random.normal(k2, shape, jnp.float32)),
        "d3": jax.nn.sigmoid(jax.random.normal(k3, shape, jnp.float32)),
        "d4": jax.nn.sigmoid(jax.random.normal(k4, shape, jnp.float32)),
    }
    if soft_labels:
        label = jax.random.uniform(k5, shape, jnp.float32)
    else:
        label = (jax.random.uniform(k5, shape) > 0.5).astype(jnp.float32)
    return pred, {"label": label}


if __name__ == "__main__":
    key = jax.random.PRNGKey(0)
    ka, kb, kc = jax.random.split(key, 3)

    def check(pred, batch, **kw):
        total, metrics = u2net_loss_v6(pred, batch, **kw)
        total = jax.block_until_ready(total)
        ref = jax.block_until_ready(_reference(pred, batch))
        assert jnp.allclose(total, ref, rtol=1e-5, atol=1e-5), (total, ref, kw)
        assert jnp.allclose(metrics["total_loss"], metrics["bce_loss"])
        return total

    # 1) Default config, aligned size (zero-padding path), grid (1,1).
    pred, batch = _make_inputs(ka, (2, 1, 32, 32))
    check(pred, batch)
    # 2) Tiny tile cap -> 2-slice parallel grid (exercises megacore split path).
    check(pred, batch, max_block_rows=8)
    # 3) Hard labels -> single-log fast path.
    check(pred, batch, binary_labels=True)

    # 4) Non-1024-multiple element count (pad-to-8x128 path) + soft labels.
    pred_u, batch_u = _make_inputs(kb, (2, 1, 30, 30), soft_labels=True)
    check(pred_u, batch_u)

    # 5) Partial tail block (in-kernel row mask) and phantom block (clamped
    #    index_map): n = 3072 -> 24 rows of 128 lanes.
    pred_m, batch_m = _make_inputs(kc, (2, 1, 32, 48))
    check(pred_m, batch_m, max_block_rows=16)   # 2 blocks, last one partial
    check(pred_m, batch_m, max_block_rows=8)    # 3 blocks on a 2x2 grid -> phantom

    print("KERNEL_OK")
</pallas_src>

<mosaic_0001>
module attributes {stable_mosaic.version = 11 : i64} {
  func.func @kernel(%arg0: i32, %arg1: i32, %arg2: memref<16x128xf32, #tpu.memory_space<vmem>>, %arg3: memref<16x128xf32, #tpu.memory_space<vmem>>, %arg4: memref<16x128xf32, #tpu.memory_space<vmem>>, %arg5: memref<16x128xf32, #tpu.memory_space<vmem>>, %arg6: memref<16x128xf32, #tpu.memory_space<vmem>>, %arg7: memref<1x4x8x128xf32, #tpu.memory_space<vmem>>) attributes {dimension_semantics = [#tpu.dimension_semantics<parallel>, #tpu.dimension_semantics<arbitrary>], iteration_bounds = array<i64: 1, 1>, scalar_prefetch = 0 : i64, scratch_operands = 0 : i64, tpu.core_type = #tpu.core_type<tc>, window_params = [{transform_indices = @transform_0, window_bounds = array<i64: 16, 128>}, {transform_indices = @transform_1, window_bounds = array<i64: 16, 128>}, {transform_indices = @transform_2, window_bounds = array<i64: 16, 128>}, {transform_indices = @transform_3, window_bounds = array<i64: 16, 128>}, {transform_indices = @transform_4, window_bounds = array<i64: 16, 128>}, {transform_indices = @transform_5, window_bounds = array<i64: 1, 4, 8, 128>}]} {
    %c0_i32 = arith.constant 0 : i32
    %0 = arith.cmpi eq, %arg1, %c0_i32 : i32
    %1 = arith.extui %0 : i1 to i32
    %c0_i32_0 = arith.constant 0 : i32
    %2 = arith.cmpi ne, %1, %c0_i32_0 : i32
    scf.if %2 {
      %cst_51 = arith.constant 0.000000e+00 : f32
      %96 = vector.broadcast %cst_51 : f32 to vector<1x4x8x128xf32>
      %c0_52 = arith.constant 0 : index
      %c0_53 = arith.constant 0 : index
      %c0_54 = arith.constant 0 : index
      %c0_55 = arith.constant 0 : index
      %97 = vector.load %arg7[%c0_52, %c0_53, %c0_54, %c0_55] : memref<1x4x8x128xf32, #tpu.memory_space<vmem>>, vector<1x4x8x128xf32>
      tpu.vector_store %arg7[%c0_52, %c0_53, %c0_54, %c0_55], %96 {strides = array<i32>} : memref<1x4x8x128xf32, #tpu.memory_space<vmem>>, vector<1x4x8x128xf32>,
    } else {
    }
    %cst = arith.constant 0.000000e+00 : f32
    %3 = vector.broadcast %cst : f32 to vector<8x128xf32>
    %c0_i32_1 = arith.constant 0 : i32
    %c16_i32 = arith.constant 16 : i32
    %4 = arith.muli %c0_i32_1, %c16_i32 : i32
    %5 = tpu.assume_multiple %4, 16 : i32
    %6 = arith.index_cast %5 : i32 to index
    %c0 = arith.constant 0 : index
    %7 = vector.load %arg6[%6, %c0] : memref<16x128xf32, #tpu.memory_space<vmem>>, vector<16x128xf32>
    %8 = arith.index_cast %5 : i32 to index
    %c0_2 = arith.constant 0 : index
    %9 = vector.load %arg2[%8, %c0_2] : memref<16x128xf32, #tpu.memory_space<vmem>>, vector<16x128xf32>
    %10 = math.log %9 : vector<16x128xf32>
    %cst_3 = arith.constant -1.000000e+02 : f32
    %11 = vector.broadcast %cst_3 : f32 to vector<16x128xf32>
    %12 = arith.maximumf %10, %11 : vector<16x128xf32>
    %cst_4 = arith.constant 1.000000e+00 : f32
    %13 = vector.broadcast %cst_4 : f32 to vector<16x128xf32>
    %14 = arith.subf %13, %9 : vector<16x128xf32>
    %15 = math.log %14 : vector<16x128xf32>
    %cst_5 = arith.constant -1.000000e+02 : f32
    %16 = vector.broadcast %cst_5 : f32 to vector<16x128xf32>
    %17 = arith.maximumf %15, %16 : vector<16x128xf32>
    %18 = arith.subf %12, %17 : vector<16x128xf32>
    %19 = arith.mulf %7, %18 : vector<16x128xf32>
    %20 = arith.addf %17, %19 : vector<16x128xf32>
    %21 = vector.shape_cast %20 : vector<16x128xf32> to vector<2x8x128xf32>
    %cst_6 = arith.constant dense<0.000000e+00> : vector<8x128xf32>
    %22 = vector.multi_reduction <add>, %21, %cst_6 [0] : vector<2x8x128xf32> to vector<8x128xf32>
    %23 = arith.addf %3, %22 : vector<8x128xf32>
    %24 = arith.index_cast %5 : i32 to index
    %c0_7 = arith.constant 0 : index
    %25 = vector.load %arg3[%24, %c0_7] : memref<16x128xf32, #tpu.memory_space<vmem>>, vector<16x128xf32>
    %26 = math.log %25 : vector<16x128xf32>
    %cst_8 = arith.constant -1.000000e+02 : f32
    %27 = vector.broadcast %cst_8 : f32 to vector<16x128xf32>
    %28 = arith.maximumf %26, %27 : vector<16x128xf32>
    %cst_9 = arith.constant 1.000000e+00 : f32
    %29 = vector.broadcast %cst_9 : f32 to vector<16x128xf32>
    %30 = arith.subf %29, %25 : vector<16x128xf32>
    %31 = math.log %30 : vector<16x128xf32>
    %cst_10 = arith.constant -1.000000e+02 : f32
    %32 = vector.broadcast %cst_10 : f32 to vector<16x128xf32>
    %33 = arith.maximumf %31, %32 : vector<16x128xf32>
    %34 = arith.subf %28, %33 : vector<16x128xf32>
    %35 = arith.mulf %7, %34 : vector<16x128xf32>
    %36 = arith.addf %33, %35 : vector<16x128xf32>
    %37 = vector.shape_cast %36 : vector<16x128xf32> to vector<2x8x128xf32>
    %cst_11 = arith.constant dense<0.000000e+00> : vector<8x128xf32>
    %38 = vector.multi_reduction <add>, %37, %cst_11 [0] : vector<2x8x128xf32> to vector<8x128xf32>
    %39 = arith.addf %3, %38 : vector<8x128xf32>
    %40 = arith.index_cast %5 : i32 to index
    %c0_12 = arith.constant 0 : index
    %41 = vector.load %arg4[%40, %c0_12] : memref<16x128xf32, #tpu.memory_space<vmem>>, vector<16x128xf32>
    %42 = math.log %41 : vector<16x128xf32>
    %cst_13 = arith.constant -1.000000e+02 : f32
    %43 = vector.broadcast %cst_13 : f32 to vector<16x128xf32>
    %44 = arith.maximumf %42, %43 : vector<16x128xf32>
    %cst_14 = arith.constant 1.000000e+00 : f32
    %45 = vector.broadcast %cst_14 : f32 to vector<16x128xf32>
    %46 = arith.subf %45, %41 : vector<16x128xf32>
    %47 = math.log %46 : vector<16x128xf32>
    %cst_15 = arith.constant -1.000000e+02 : f32
    %48 = vector.broadcast %cst_15 : f32 to vector<16x128xf32>
    %49 = arith.maximumf %47, %48 : vector<16x128xf32>
    %50 = arith.subf %44, %49 : vector<16x128xf32>
    %51 = arith.mulf %7, %50 : vector<16x128xf32>
    %52 = arith.addf %49, %51 : vector<16x128xf32>
    %53 = vector.shape_cast %52 : vector<16x128xf32> to vector<2x8x128xf32>
    %cst_16 = arith.constant dense<0.000000e+00> : vector<8x128xf32>
    %54 = vector.multi_reduction <add>, %53, %cst_16 [0] : vector<2x8x128xf32> to vector<8x128xf32>
    %55 = arith.addf %3, %54 : vector<8x128xf32>
    %56 = arith.index_cast %5 : i32 to index
    %c0_17 = arith.constant 0 : index
    %57 = vector.load %arg5[%56, %c0_17] : memref<16x128xf32, #tpu.memory_space<vmem>>, vector<16x128xf32>
    %58 = math.log %57 : vector<16x128xf32>
    %cst_18 = arith.constant -1.000000e+02 : f32
    %59 = vector.broadcast %cst_18 : f32 to vector<16x128xf32>
    %60 = arith.maximumf %58, %59 : vector<16x128xf32>
    %cst_19 = arith.constant 1.000000e+00 : f32
    %61 = vector.broadcast %cst_19 : f32 to vector<16x128xf32>
    %62 = arith.subf %61, %57 : vector<16x128xf32>
    %63 = math.log %62 : vector<16x128xf32>
    %cst_20 = arith.constant -1.000000e+02 : f32
    %64 = vector.broadcast %cst_20 : f32 to vector<16x128xf32>
    %65 = arith.maximumf %63, %64 : vector<16x128xf32>
    %66 = arith.subf %60, %65 : vector<16x128xf32>
    %67 = arith.mulf %7, %66 : vector<16x128xf32>
    %68 = arith.addf %65, %67 : vector<16x128xf32>
    %69 = vector.shape_cast %68 : vector<16x128xf32> to vector<2x8x128xf32>
    %cst_21 = arith.constant dense<0.000000e+00> : vector<8x128xf32>
    %70 = vector.multi_reduction <add>, %69, %cst_21 [0] : vector<2x8x128xf32> to vector<8x128xf32>
    %71 = arith.addf %3, %70 : vector<8x128xf32>
    %c1_i32 = arith.constant 1 : i32
    %c0_22 = arith.constant 0 : index
    %c0_23 = arith.constant 0 : index
    %c0_24 = arith.constant 0 : index
    %c0_25 = arith.constant 0 : index
    %72 = vector.load %arg7[%c0_22, %c0_23, %c0_24, %c0_25] : memref<1x4x8x128xf32, #tpu.memory_space<vmem>>, vector<1x1x8x128xf32>
    %73 = vector.shape_cast %72 : vector<1x1x8x128xf32> to vector<8x128xf32>
    %74 = arith.addf %73, %23 : vector<8x128xf32>
    %c0_26 = arith.constant 0 : index
    %c0_27 = arith.constant 0 : index
    %c0_28 = arith.constant 0 : index
    %c0_29 = arith.constant 0 : index
    %75 = vector.load %arg7[%c0_26, %c0_27, %c0_28, %c0_29] : memref<1x4x8x128xf32, #tpu.memory_space<vmem>>, vector<1x1x8x128xf32>
    %76 = vector.shape_cast %75 : vector<1x1x8x128xf32> to vector<8x128xf32>
    %77 = vector.shape_cast %74 : vector<8x128xf32> to vector<1x1x8x128xf32>
    tpu.vector_store %arg7[%c0_26, %c0_27, %c0_28, %c0_29], %77 {strides = array<i32>} : memref<1x4x8x128xf32, #tpu.memory_space<vmem>>, vector<1x1x8x128xf32>,
    %c0_30 = arith.constant 0 : index
    %c1 = arith.constant 1 : index
    %c0_31 = arith.constant 0 : index
    %c0_32 = arith.constant 0 : index
    %78 = vector.load %arg7[%c0_30, %c1, %c0_31, %c0_32] : memref<1x4x8x128xf32, #tpu.memory_space<vmem>>, vector<1x1x8x128xf32>
    %79 = vector.shape_cast %78 : vector<1x1x8x128xf32> to vector<8x128xf32>
    %80 = arith.addf %79, %39 : vector<8x128xf32>
    %c0_33 = arith.constant 0 : index
    %c1_34 = arith.constant 1 : index
    %c0_35 = arith.constant 0 : index
    %c0_36 = arith.constant 0 : index
    %81 = vector.load %arg7[%c0_33, %c1_34, %c0_35, %c0_36] : memref<1x4x8x128xf32, #tpu.memory_space<vmem>>, vector<1x1x8x128xf32>
    %82 = vector.shape_cast %81 : vector<1x1x8x128xf32> to vector<8x128xf32>
    %83 = vector.shape_cast %80 : vector<8x128xf32> to vector<1x1x8x128xf32>
    tpu.vector_store %arg7[%c0_33, %c1_34, %c0_35, %c0_36], %83 {strides = array<i32>} : memref<1x4x8x128xf32, #tpu.memory_space<vmem>>, vector<1x1x8x128xf32>,
    %c0_37 = arith.constant 0 : index
    %c2 = arith.constant 2 : index
    %c0_38 = arith.constant 0 : index
    %c0_39 = arith.constant 0 : index
    %84 = vector.load %arg7[%c0_37, %c2, %c0_38, %c0_39] : memref<1x4x8x128xf32, #tpu.memory_space<vmem>>, vector<1x1x8x128xf32>
    %85 = vector.shape_cast %84 : vector<1x1x8x128xf32> to vector<8x128xf32>
    %86 = arith.addf %85, %55 : vector<8x128xf32>
    %c0_40 = arith.constant 0 : index
    %c2_41 = arith.constant 2 : index
    %c0_42 = arith.constant 0 : index
    %c0_43 = arith.constant 0 : index
    %87 = vector.load %arg7[%c0_40, %c2_41, %c0_42, %c0_43] : memref<1x4x8x128xf32, #tpu.memory_space<vmem>>, vector<1x1x8x128xf32>
    %88 = vector.shape_cast %87 : vector<1x1x8x128xf32> to vector<8x128xf32>
    %89 = vector.shape_cast %86 : vector<8x128xf32> to vector<1x1x8x128xf32>
    tpu.vector_store %arg7[%c0_40, %c2_41, %c0_42, %c0_43], %89 {strides = array<i32>} : memref<1x4x8x128xf32, #tpu.memory_space<vmem>>, vector<1x1x8x128xf32>,
    %c0_44 = arith.constant 0 : index
    %c3 = arith.constant 3 : index
    %c0_45 = arith.constant 0 : index
    %c0_46 = arith.constant 0 : index
    %90 = vector.load %arg7[%c0_44, %c3, %c0_45, %c0_46] : memref<1x4x8x128xf32, #tpu.memory_space<vmem>>, vector<1x1x8x128xf32>
    %91 = vector.shape_cast %90 : vector<1x1x8x128xf32> to vector<8x128xf32>
    %92 = arith.addf %91, %71 : vector<8x128xf32>
    %c0_47 = arith.constant 0 : index
    %c3_48 = arith.constant 3 : index
    %c0_49 = arith.constant 0 : index
    %c0_50 = arith.constant 0 : index
    %93 = vector.load %arg7[%c0_47, %c3_48, %c0_49, %c0_50] : memref<1x4x8x128xf32, #tpu.memory_space<vmem>>, vector<1x1x8x128xf32>
    %94 = vector.shape_cast %93 : vector<1x1x8x128xf32> to vector<8x128xf32>
    %95 = vector.shape_cast %92 : vector<8x128xf32> to vector<1x1x8x128xf32>
    tpu.vector_store %arg7[%c0_47, %c3_48, %c0_49, %c0_50], %95 {strides = array<i32>} : memref<1x4x8x128xf32, #tpu.memory_space<vmem>>, vector<1x1x8x128xf32>,
    return
  }
  func.func @transform_0(%arg0: i32, %arg1: i32) -> (i32, i32) {
    %c1_i32 = arith.constant 1 : i32
    %0 = arith.muli %arg0, %c1_i32 : i32
    %1 = arith.addi %0, %arg1 : i32
    %c0_i32 = arith.constant 0 : i32
    %c0_i32_0 = arith.constant 0 : i32
    return %1, %c0_i32 : i32, i32
  }
  func.func @transform_1(%arg0: i32, %arg1: i32) -> (i32, i32) {
    %c1_i32 = arith.constant 1 : i32
    %0 = arith.muli %arg0, %c1_i32 : i32
    %1 = arith.addi %0, %arg1 : i32
    %c0_i32 = arith.constant 0 : i32
    %c0_i32_0 = arith.constant 0 : i32
    return %1, %c0_i32 : i32, i32
  }
  func.func @transform_2(%arg0: i32, %arg1: i32) -> (i32, i32) {
    %c1_i32 = arith.constant 1 : i32
    %0 = arith.muli %arg0, %c1_i32 : i32
    %1 = arith.addi %0, %arg1 : i32
    %c0_i32 = arith.constant 0 : i32
    %c0_i32_0 = arith.constant 0 : i32
    return %1, %c0_i32 : i32, i32
  }
  func.func @transform_3(%arg0: i32, %arg1: i32) -> (i32, i32) {
    %c1_i32 = arith.constant 1 : i32
    %0 = arith.muli %arg0, %c1_i32 : i32
    %1 = arith.addi %0, %arg1 : i32
    %c0_i32 = arith.constant 0 : i32
    %c0_i32_0 = arith.constant 0 : i32
    return %1, %c0_i32 : i32, i32
  }
  func.func @transform_4(%arg0: i32, %arg1: i32) -> (i32, i32) {
    %c1_i32 = arith.constant 1 : i32
    %0 = arith.muli %arg0, %c1_i32 : i32
    %1 = arith.addi %0, %arg1 : i32
    %c0_i32 = arith.constant 0 : i32
    %c0_i32_0 = arith.constant 0 : i32
    return %1, %c0_i32 : i32, i32
  }
  func.func @transform_5(%arg0: i32, %arg1: i32) -> (i32, i32, i32, i32) {
    %c0_i32 = arith.constant 0 : i32
    %c0_i32_0 = arith.constant 0 : i32
    %c0_i32_1 = arith.constant 0 : i32
    %c0_i32_2 = arith.constant 0 : i32
    return %arg0, %c0_i32, %c0_i32_0, %c0_i32_1 : i32, i32, i32, i32
  }
}

</mosaic_0001>

<bundles_post_ra>
// kernel: tpu_custom_call.1
= control target key start
LH: loop header
LB: loop body
LE: loop exit
PB: predicated region body
PF: predicated region fallthrough
CT: control target
= control target key end

     0   :  { %10 = vsyncpa [#allocation3], 0  ;;  %s582_s0 = inlined_call_operand.hbm [shape: f32[16,128], index: 0, kind: input, shape index: {}]   ;;  %s583_s1 = inlined_call_operand.hbm [shape: f32[16,128], index: 1, kind: input, shape index: {}]   ;;  %s584_s2 = inlined_call_operand.hbm [shape: f32[16,128], index: 2, kind: input, shape index: {}]   ;;  %s585_s3 = inlined_call_operand.hbm [shape: f32[16,128], index: 3, kind: input, shape index: {}]   ;;  %s586_s4 = inlined_call_operand.hbm [shape: f32[16,128], index: 4, kind: input, shape index: {}]   ;;  %s587_s5 = inlined_call_operand.hbm [shape: f32[1,4,8,128], index: 5, kind: output, shape index: {}]  }
   0x1   :  { %11 = vsyncpa [#allocation6], 0 }
   0x2   :  { %12 = vsyncpa [#allocation9], 0 }
   0x3   :  { %13 = vsyncpa [#allocation4], 0  ;;  %s440_s18 = smov [#allocation5]   ;;  %s441_s20 = smov [#allocation8]  }
   0x4   :  { %s39_s19 = sshll.u32 %s440_s18, 4  ;;  %s71_s21 = sshll.u32 %s441_s20, 4  ;;  %s40_s19 = int_to_ptr.vmem [resolvable:$true] %s39_s19  ;;  %s478_s21 = int_to_ptr.vmem [resolvable:$true] %s71_s21 }
   0x5   :  { %s300_s24 = scalar_lea.hbm %s583_s1, 256 }
   0x6   :  { %p301_p0 = scmp.ne.s32.totalorder %s583_s1, %s300_s24  ;;  %p304_p1 = scmp.lt.u32.totalorder %s300_s24, %s583_s1 }
   0x8   :  { %p306_p2 = pnand %p304_p1, %p301_p0 }
   0xa   :  { %309 = shalt.err (!%p306_p2)
}
   0xb   :  { %s310_s29 = scalar_lea.vmem %s40_s19, 256  ;;  %p315_p4 = scmp.lt.s32.totalorder %s40_s19, %s40_s19 }
   0xc   :  { %p311_p3 = scmp.ne.s32.totalorder %s40_s19, %s310_s29  ;;  %p316_p5 = scmp.lt.s32.totalorder %s310_s29, %s310_s29 }
   0xe   :  { %p317_p6 = por %p316_p5, %p315_p4 }
  0x10   :  { %p318_p7 = pnand %p317_p6, %p311_p3 }
  0x12   :  { %321 = shalt.err (!%p318_p7)
}
  0x13   :  { %s442_s30 = smov 128   ;;  %s443_s6 = smov 8  }
  0x14   :  { %45 = dma.hbm_to_vmem [thread:$0]  %s583_s1, 256, %s40_s19, [#allocation6], %s442_s30, %s442_s30, %s443_s6  }
  0x15   :  { %s322_s11 = scalar_lea.hbm %s585_s3, 256 }
  0x16   :  { %p323_p8 = scmp.ne.s32.totalorder %s585_s3, %s322_s11  ;;  %p326_p9 = scmp.lt.u32.totalorder %s322_s11, %s585_s3 }
  0x18   :  { %p328_p10 = pnand %p326_p9, %p323_p8 }
  0x1a   :  { %331 = shalt.err (!%p328_p10)
}
  0x1b   :  { %s332_s16 = scalar_lea.vmem %s478_s21, 256  ;;  %p337_p12 = scmp.lt.s32.totalorder %s478_s21, %s478_s21 }
  0x1c   :  { %p333_p11 = scmp.ne.s32.totalorder %s478_s21, %s332_s16  ;;  %p338_p13 = scmp.lt.s32.totalorder %s332_s16, %s332_s16 }
  0x1e   :  { %p339_p0 = por %p338_p13, %p337_p12 }
  0x20   :  { %p340_p1 = pnand %p339_p0, %p333_p11 }
  0x22   :  { %343 = shalt.err (!%p340_p1)
}
  0x23   :  { %77 = dma.hbm_to_vmem [thread:$0]  %s585_s3, 256, %s478_s21, [#allocation9], %s442_s30, %s442_s30, %s443_s6  }
  0x24   :  { %s444_s18 = smov [#allocation2]   ;;  %s445_s20 = smov [#allocation7]  }
  0x25   :  { %s23_s19 = sshll.u32 %s444_s18, 4  ;;  %s55_s22 = sshll.u32 %s445_s20, 4  ;;  %s24_s19 = int_to_ptr.vmem [resolvable:$true] %s23_s19  ;;  %s515_s22 = int_to_ptr.vmem [resolvable:$true] %s55_s22 }
  0x26   :  { %s344_s25 = scalar_lea.hbm %s582_s0, 256 }
  0x27   :  { %p345_p2 = scmp.ne.s32.totalorder %s582_s0, %s344_s25  ;;  %p348_p3 = scmp.lt.u32.totalorder %s344_s25, %s582_s0 }
  0x29   :  { %p350_p4 = pnand %p348_p3, %p345_p2 }
  0x2b   :  { %353 = shalt.err (!%p350_p4)
}
  0x2c   :  { %s354_s3 = scalar_lea.vmem %s24_s19, 256  ;;  %p359_p6 = scmp.lt.s32.totalorder %s24_s19, %s24_s19 }
  0x2d   :  { %p355_p5 = scmp.ne.s32.totalorder %s24_s19, %s354_s3  ;;  %p360_p7 = scmp.lt.s32.totalorder %s354_s3, %s354_s3 }
  0x2f   :  { %p361_p8 = por %p360_p7, %p359_p6 }
  0x31   :  { %p362_p9 = pnand %p361_p8, %p355_p5 }
  0x33   :  { %365 = shalt.err (!%p362_p9)
}
  0x34   :  { %29 = dma.hbm_to_vmem [thread:$0]  %s582_s0, 256, %s24_s19, [#allocation3], %s442_s30, %s442_s30, %s443_s6  }
  0x35   :  { %s366_s10 = scalar_lea.hbm %s584_s2, 256 }
  0x36   :  { %p367_p10 = scmp.ne.s32.totalorder %s584_s2, %s366_s10  ;;  %p370_p11 = scmp.lt.u32.totalorder %s366_s10, %s584_s2 }
  0x38   :  { %p372_p12 = pnand %p370_p11, %p367_p10 }
  0x3a   :  { %375 = shalt.err (!%p372_p12)
}
  0x3b   :  { %s376_s15 = scalar_lea.vmem %s515_s22, 256  ;;  %p381_p0 = scmp.lt.s32.totalorder %s515_s22, %s515_s22 }
  0x3c   :  { %p377_p13 = scmp.ne.s32.totalorder %s515_s22, %s376_s15  ;;  %p382_p1 = scmp.lt.s32.totalorder %s376_s15, %s376_s15 }
  0x3e   :  { %p383_p2 = por %p382_p1, %p381_p0 }
  0x40   :  { %p384_p3 = pnand %p383_p2, %p377_p13 }
  0x42   :  { %387 = shalt.err (!%p384_p3)
}
  0x43   :  { %61 = dma.hbm_to_vmem [thread:$0]  %s584_s2, 256, %s515_s22, [#allocation6], %s442_s30, %s442_s30, %s443_s6  }
  0x44   :  { %s446_s1 = smov [#allocation10]   ;;  %s388_s20 = scalar_lea.hbm %s586_s4, 256 }
  0x45   :  { %s87_s17 = sshll.u32 %s446_s1, 4  ;;  %p389_p4 = scmp.ne.s32.totalorder %s586_s4, %s388_s20  ;;  %s88_s17 = int_to_ptr.vmem [resolvable:$true] %s87_s17 }
  0x46   :  { %p392_p5 = scmp.lt.u32.totalorder %s388_s20, %s586_s4 }
  0x48   :  { %p394_p6 = pnand %p392_p5, %p389_p4 }
  0x4a   :  { %397 = shalt.err (!%p394_p6)
}
  0x4b   :  { %s398_s27 = scalar_lea.vmem %s88_s17, 256  ;;  %p403_p8 = scmp.lt.s32.totalorder %s88_s17, %s88_s17 }
  0x4c   :  { %p399_p7 = scmp.ne.s32.totalorder %s88_s17, %s398_s27  ;;  %p404_p9 = scmp.lt.s32.totalorder %s398_s27, %s398_s27 }
  0x4e   :  { %p405_p10 = por %p404_p9, %p403_p8 }
  0x50   :  { %p406_p11 = pnand %p405_p10, %p399_p7 }
  0x52   :  { %409 = shalt.err (!%p406_p11)
}
  0x53   :  { %93 = dma.hbm_to_vmem [thread:$0]  %s586_s4, 256, %s88_s17, [#allocation9], %s442_s30, %s442_s30, %s443_s6  }
  0x54   :  { %432 = dma.done.wait [#allocation3], 256  }
  0x55   :  { %433 = vsyncadd [#allocation3], 4294967040 }
  0x56   :  { %434 = dma.done.wait [#allocation6], 512  }
  0x57   :  { %435 = vsyncadd [#allocation6], 4294966784 }
  0x58   :  { %436 = dma.done.wait [#allocation9], 512  }
  0x59   :  { %437 = vsyncadd [#allocation9], 4294966784  ;;  %v129_v0 = vld [vmem:[#allocation2] sm:$0xff]  ;;  %v130_v1 = vld [vmem:[#allocation2 + $0x8] sm:$0xff]  ;;  %s447_s4 = smov [#allocation11]  }
  0x5a   :  { %268 = vlog2.f32 %v129_v0  ;;  %v137_v2 = vsub.f32 1.0, %v129_v0  ;;  %v153_v3 = vld [vmem:[#allocation5] sm:$0xff]  ;;  %v154_v4 = vld [vmem:[#allocation5 + $0x8] sm:$0xff]  ;;  %v138_v5 = vsub.f32 1.0, %v130_v1  ;;  %v177_v8 = vld [vmem:[#allocation7] sm:$0xff]  ;;  %s245_s28 = sshll.u32 %s447_s4, 4  ;;  %s246_s28 = int_to_ptr.vmem [resolvable:$true] %s245_s28 }
  0x5b   :  { %270 = vlog2.f32 %v130_v1  ;;  %v161_v6 = vsub.f32 1.0, %v153_v3  ;;  %v162_v7 = vsub.f32 1.0, %v154_v4  ;;  %v178_v9 = vld [vmem:[#allocation7 + $0x8] sm:$0xff]  ;;  %v185_v10 = vsub.f32 1.0, %v177_v8  ;;  %v201_v12 = vld [vmem:[#allocation8] sm:$0xff]  ;;  %v202_v13 = vld [vmem:[#allocation8 + $0x8] sm:$0xff]  ;;  %p415_p13 = scmp.lt.s32.totalorder %s246_s28, %s246_s28 }
  0x5c   :  { %272 = vlog2.f32 %v137_v2  ;;  %v186_v11 = vsub.f32 1.0, %v178_v9  ;;  %v209_v15 = vsub.f32 1.0, %v201_v12  ;;  %v210_v18 = vsub.f32 1.0, %v202_v13  ;;  %v127_v31 = vld [vmem:[#allocation10] sm:$0xff]  ;;  %v128_v35 = vld [vmem:[#allocation10 + $0x8] sm:$0xff]  ;;  %s410_s29 = scalar_lea.vmem %s246_s28, 512 }
  0x5d   :  { %274 = vlog2.f32 %v138_v5  ;;  %p411_p12 = scmp.ne.s32.totalorder %s246_s28, %s410_s29  ;;  %p416_p0 = scmp.lt.s32.totalorder %s410_s29, %s410_s29 }
  0x5e   :  { %276 = vlog2.f32 %v153_v3 }
  0x5f   :  { %278 = vlog2.f32 %v154_v4  ;;  %p417_p1 = por %p416_p0, %p415_p13 }
  0x60   :  { %280 = vlog2.f32 %v161_v6 }
  0x61   :  { %282 = vlog2.f32 %v162_v7  ;;  %p418_p2 = pnand %p417_p1, %p411_p12 }
  0x62   :  { %284 = vlog2.f32 %v177_v8 }
  0x63   :  { %286 = vlog2.f32 %v178_v9 }
  0x64   :  { %v269_v14 = vpop.eup %268  ;;  %288 = vlog2.f32 %v185_v10 }
  0x65   :  { %v271_v16 = vpop.eup %270  ;;  %v132_v17 = vmul.f32 0.6931472, %v269_v14  ;;  %290 = vlog2.f32 %v186_v11 }
  0x66   :  { %v273_v19 = vpop.eup %272  ;;  %v134_v20 = vmul.f32 0.6931472, %v271_v16  ;;  %292 = vlog2.f32 %v201_v12 }
  0x67   :  { %v275_v21 = vpop.eup %274  ;;  %v135_v22 = vmax.f32 %v132_v17, -100.0  ;;  %v140_v23 = vmul.f32 0.6931472, %v273_v19  ;;  %294 = vlog2.f32 %v202_v13 }
  0x68   :  { %v277_v24 = vpop.eup %276  ;;  %v136_v25 = vmax.f32 %v134_v20, -100.0  ;;  %v142_v26 = vmul.f32 0.6931472, %v275_v21  ;;  %296 = vlog2.f32 %v209_v15 }
  0x69   :  { %v279_v27 = vpop.eup %278  ;;  %v143_v28 = vmax.f32 %v140_v23, -100.0  ;;  %v156_v29 = vmul.f32 0.6931472, %v277_v24  ;;  %298 = vlog2.f32 %v210_v18 }
  0x6a   :  { %v281_v30 = vpop.eup %280  ;;  %v144_v32 = vmax.f32 %v142_v26, -100.0  ;;  %v158_v33 = vmul.f32 0.6931472, %v279_v27 }
  0x6b   :  { %v283_v34 = vpop.eup %282  ;;  %v145_v36 = vsub.f32 %v135_v22, %v143_v28  ;;  %v159_v37 = vmax.f32 %v156_v29, -100.0  ;;  %v164_v38 = vmul.f32 0.6931472, %v281_v30 }
  0x6c   :  { %v285_v39 = vpop.eup %284  ;;  %v146_v40 = vsub.f32 %v136_v25, %v144_v32  ;;  %v160_v41 = vmax.f32 %v158_v33, -100.0  ;;  %v166_v42 = vmul.f32 0.6931472, %v283_v34 }
  0x6d   :  { %v287_v43 = vpop.eup %286  ;;  %v147_v44 = vmul.f32 %v145_v36, %v127_v31  ;;  %v167_v45 = vmax.f32 %v164_v38, -100.0  ;;  %v180_v46 = vmul.f32 0.6931472, %v285_v39 }
  0x6e   :  { %v289_v47 = vpop.eup %288  ;;  %v148_v48 = vmul.f32 %v146_v40, %v128_v35  ;;  %v168_v49 = vmax.f32 %v166_v42, -100.0  ;;  %v182_v50 = vmul.f32 0.6931472, %v287_v43 }
  0x6f   :  { %v291_v51 = vpop.eup %290  ;;  %v149_v52 = vadd.f32 %v147_v44, %v143_v28  ;;  %v169_v53 = vsub.f32 %v159_v37, %v167_v45  ;;  %v183_v54 = vmax.f32 %v180_v46, -100.0  ;;  %v188_v55 = vmul.f32 0.6931472, %v289_v47 }
  0x70   :  { %v293_v56 = vpop.eup %292  ;;  %v150_v57 = vadd.f32 %v148_v48, %v144_v32  ;;  %v170_v58 = vsub.f32 %v160_v41, %v168_v49  ;;  %v184_v59 = vmax.f32 %v182_v50, -100.0  ;;  %v190_v60 = vmul.f32 0.6931472, %v291_v51 }
  0x71   :  { %v295_v61 = vpop.eup %294  ;;  %v171_v62 = vmul.f32 %v169_v53, %v127_v31  ;;  %v191_v63 = vmax.f32 %v188_v55, -100.0  ;;  %v204_v0 = vmul.f32 0.6931472, %v293_v56 }
  0x72   :  { %v297_v1 = vpop.eup %296  ;;  %v151_v2 = vadd.f32 %v150_v57, %v149_v52  ;;  %v172_v3 = vmul.f32 %v170_v58, %v128_v35  ;;  %v192_v4 = vmax.f32 %v190_v60, -100.0  ;;  %v206_v5 = vmul.f32 0.6931472, %v295_v61 }
  0x73   :  { %v299_v6 = vpop.eup %298  ;;  %v173_v7 = vadd.f32 %v171_v62, %v167_v45  ;;  %v193_v8 = vsub.f32 %v183_v54, %v191_v63  ;;  %v207_v9 = vmax.f32 %v204_v0, -100.0  ;;  %v212_v10 = vmul.f32 0.6931472, %v297_v1 }
  0x74   :  { %v174_v11 = vadd.f32 %v172_v3, %v168_v49  ;;  %v194_v12 = vsub.f32 %v184_v59, %v192_v4  ;;  %v208_v14 = vmax.f32 %v206_v5, -100.0  ;;  %v214_v15 = vmul.f32 0.6931472, %v299_v6  ;;  %227 = vst [vmem:[#allocation11] sm:$0xff] %v151_v2 }
  0x75   :  { %v195_v13 = vmul.f32 %v193_v8, %v127_v31  ;;  %v215_v16 = vmax.f32 %v212_v10, -100.0 }
  0x76   :  { %v175_v17 = vadd.f32 %v174_v11, %v173_v7  ;;  %v196_v18 = vmul.f32 %v194_v12, %v128_v35  ;;  %v216_v20 = vmax.f32 %v214_v15, -100.0 }
  0x77   :  { %v197_v19 = vadd.f32 %v195_v13, %v191_v63  ;;  %v217_v21 = vsub.f32 %v207_v9, %v215_v16 }
  0x78   :  { %v198_v22 = vadd.f32 %v196_v18, %v192_v4  ;;  %v218_v23 = vsub.f32 %v208_v14, %v216_v20  ;;  %231 = vst [vmem:[#allocation11 + $0x8] sm:$0xff] %v175_v17 }
  0x79   :  { %v219_v24 = vmul.f32 %v217_v21, %v127_v31 }
  0x7a   :  { %v199_v25 = vadd.f32 %v198_v22, %v197_v19  ;;  %v220_v26 = vmul.f32 %v218_v23, %v128_v35 }
  0x7b   :  { %v221_v27 = vadd.f32 %v219_v24, %v215_v16 }
  0x7c   :  { %v222_v28 = vadd.f32 %v220_v26, %v216_v20  ;;  %235 = vst [vmem:[#allocation11 + $0x10] sm:$0xff] %v199_v25 }
  0x7e   :  { %v223_v29 = vadd.f32 %v222_v28, %v221_v27 }
  0x80   :  { %239 = vst [vmem:[#allocation11 + $0x18] sm:$0xff] %v223_v29 }
  0x81   :  { %421 = shalt.err (!%p418_p2)
}
  0x82   :  { %s422_s7 = scalar_lea.hbm %s587_s5, 512 }
  0x83   :  { %p423_p3 = scmp.ne.s32.totalorder %s587_s5, %s422_s7  ;;  %p426_p4 = scmp.lt.u32.totalorder %s422_s7, %s587_s5 }
  0x85   :  { %p428_p5 = pnand %p426_p4, %p423_p3 }
  0x87   :  { %431 = shalt.err (!%p428_p5)
}
  0x88   :  { %251 = dma.vmem_to_hbm [thread:$0]  %s246_s28, 512, %s587_s5, [#allocation4], %s442_s30, %s442_s30, %s443_s6  }
  0x89   :  { %438 = dma.done.wait [#allocation4], 512  }
  0x8a   :  { %439 = vsyncadd [#allocation4], 4294966784 }
  0x8b   :  { %255 = vsyncpa [#allocation3], 1 }
  0x8c   :  { %256 = vsyncpa [#allocation6], 1 }
  0x8d   :  { %257 = vsyncpa [#allocation9], 1 }
  0x8e   :  { %258 = vsyncpa [#allocation4], 1 }

</bundles_post_ra>
